<compile_context>
chip_gen: v7x
topology: tpu7x:2x2x1
jax: 0.10.0
libtpu: 0.0.40
codegen_flags: <defaults>
</compile_context>

<pallas_src>
import functools

import jax
import jax.numpy as jnp
from jax.experimental import pallas as pl
from jax.experimental.pallas import tpu as pltpu


def _silu(x):
    return x * jax.nn.sigmoid(x)


def _round_up(x, m):
    return (x + m - 1) // m * m


def _cdiv(a, b):
    return -(-a // b)


# ---------------------------------------------------------------------------
# Main kernel: LayerNorm -> *(1+scale)+shift -> SiLU -> Linear_o per (b, t-tile).
# ---------------------------------------------------------------------------
def _stylize_kernel(h_ref, scale_ref, shift_ref, gamma_ref, beta_ref,
                    w_out_ref, b_out_ref, o_ref):
    h = h_ref[0].astype(jnp.float32)                         # (TT, D)

    # LayerNorm over the (unpadded) channel dim.
    mean = jnp.mean(h, axis=-1, keepdims=True)
    centered = h - mean
    var = jnp.mean(centered * centered, axis=-1, keepdims=True)
    h_norm = centered * jax.lax.rsqrt(var + 1e-5)
    h_norm = (h_norm * gamma_ref[...].astype(jnp.float32)
              + beta_ref[...].astype(jnp.float32))

    # Stylization.
    y = h_norm * (1.0 + scale_ref[0]) + shift_ref[0]

    # out_layers: SiLU -> Dropout (identity, eval) -> Linear(D, D)
    act = _silu(y)
    # TODO(synk): training-mode dropout would be applied to `act` here.
    out = jnp.dot(act.astype(w_out_ref.dtype), w_out_ref[...],
                  preferred_element_type=jnp.float32) + b_out_ref[...]
    o_ref[0] = out.astype(o_ref.dtype)


def _choose_tile_t(T, D, B, w_bytes, weight_copies):
    """Pick the T-tile (multiple of 8, or == T) under a conservative VMEM budget."""
    weight_bytes = weight_copies * D * D * w_bytes + 32 * D * 4
    budget = 40 * (1 << 20)               # headroom below the 48 MiB limit cap
    tt = 1024
    while tt > 8 and 4 * tt * D * 4 + weight_bytes > budget:
        tt //= 2
    if T <= tt:
        tt = T                            # full-extent block: always legal
    num_t = _cdiv(T, tt)
    # v7x megacore: want >= ~4 independent grid units so both TCs stay busy.
    if B * num_t < 4 and T >= 32:
        want = _cdiv(4, B)
        cand = _round_up(_cdiv(T, want), 8)
        if 8 <= cand < tt:
            tt = cand
            num_t = _cdiv(T, tt)
    return tt, num_t


@functools.partial(jax.jit, static_argnames=("matmul_dtype",))
def stylization_block(h, emb, w_emb, b_emb, gamma, beta, w_out, b_out,
                      matmul_dtype=jnp.bfloat16):
    """StylizationBlock forward.

    h:     (B, T, D) f32        emb: (B, 1, E) f32
    w_emb: (E, 2D)  b_emb: (2D,)        (y = x @ W layout)
    gamma, beta: (D,)   LayerNorm affine
    w_out: (D, D)   b_out: (D,)
    matmul_dtype: operand dtype for the (T,D)x(D,D) matmul (bf16 default —
                  native MXU fast path; accumulation stays f32).
    """
    B, T, D = h.shape
    E = emb.shape[-1]
    assert emb.shape == (B, 1, E)
    assert w_emb.shape == (E, 2 * D) and b_emb.shape == (2 * D,)
    assert gamma.shape == (D,) and beta.shape == (D,)
    assert w_out.shape == (D, D) and b_out.shape == (D,)

    # --- emb path in plain XLA (tiny; avoids an extra kernel launch) -------
    e = _silu(emb.reshape(B, E).astype(jnp.float32))
    emb_out = e @ w_emb.astype(jnp.float32) + b_emb.astype(jnp.float32)  # (B, 2D)
    scale = emb_out[:, :D].reshape(B, 1, D)
    shift = emb_out[:, D:].reshape(B, 1, D)

    gamma2 = gamma.reshape(1, D).astype(jnp.float32)
    beta2 = beta.reshape(1, D).astype(jnp.float32)
    b_out2 = b_out.reshape(1, D).astype(jnp.float32)
    w_out_c = w_out.astype(matmul_dtype)        # cast once; halves DMA for bf16

    w_bytes = jnp.dtype(matmul_dtype).itemsize
    single_buffer_w = D >= 1024                 # grid-invariant weight, fetched once
    weight_copies = 1 if single_buffer_w else 2
    TT, num_t = _choose_tile_t(T, D, B, w_bytes, weight_copies)

    # --- VMEM limit: explicit (generation-aware) only when needed ----------
    vmem_est = (4 * TT * D * 4                       # double-buffered h in/out tiles
                + weight_copies * D * D * w_bytes    # weight
                + 32 * D * 4)                        # gamma/beta/bias/scale/shift
    cp_kwargs = dict(dimension_semantics=("parallel", "parallel"))
    if vmem_est > 12 * (1 << 20):
        # Above v5e's 16 MiB default scoped budget (with margin); cap well below
        # v7x's 64 MiB physical VMEM so the compiler keeps internal headroom.
        cp_kwargs["vmem_limit_bytes"] = int(min(48 * (1 << 20), 2 * vmem_est))

    w_spec_kwargs = {}
    if single_buffer_w:
        w_spec_kwargs["pipeline_mode"] = pl.Buffered(1)

    cost = pl.CostEstimate(
        flops=int(2 * B * T * D * D + 12 * B * T * D),
        transcendentals=int(B * T * D),
        bytes_accessed=int(4 * 2 * B * T * D + w_bytes * D * D
                           + 4 * (2 * B * D + 4 * D)),
    )

    out = pl.pallas_call(
        _stylize_kernel,
        out_shape=jax.ShapeDtypeStruct((B, T, D), h.dtype),
        grid_spec=pltpu.PrefetchScalarGridSpec(
            num_scalar_prefetch=0,
            grid=(B, num_t),
            in_specs=[
                pl.BlockSpec((1, TT, D), lambda b, t: (b, t, 0)),   # h
                pl.BlockSpec((1, 1, D), lambda b, t: (b, 0, 0)),    # scale
                pl.BlockSpec((1, 1, D), lambda b, t: (b, 0, 0)),    # shift
                pl.BlockSpec((1, D), lambda b, t: (0, 0)),          # gamma
                pl.BlockSpec((1, D), lambda b, t: (0, 0)),          # beta
                pl.BlockSpec((D, D), lambda b, t: (0, 0),           # w_out
                             **w_spec_kwargs),
                pl.BlockSpec((1, D), lambda b, t: (0, 0)),          # b_out
            ],
            out_specs=pl.BlockSpec((1, TT, D), lambda b, t: (b, t, 0)),
        ),
        compiler_params=pltpu.CompilerParams(**cp_kwargs),
        cost_estimate=cost,
    )(h, scale, shift, gamma2, beta2, w_out_c, b_out2)

    return out


# ---------------------------------------------------------------------------
# Pure-JAX reference + test harness
# ---------------------------------------------------------------------------
def _reference(h, emb, w_emb, b_emb, gamma, beta, w_out, b_out):
    D = h.shape[-1]
    emb_out = _silu(emb) @ w_emb + b_emb                   # (B, 1, 2D)
    scale, shift = emb_out[..., :D], emb_out[..., D:]
    mean = jnp.mean(h, axis=-1, keepdims=True)
    var = jnp.mean(jnp.square(h - mean), axis=-1, keepdims=True)
    hn = (h - mean) * jax.lax.rsqrt(var + 1e-5) * gamma + beta
    y = hn * (1.0 + scale) + shift
    return _silu(y) @ w_out + b_out


def _make_inputs(key, B, T, D, E):
    ks = jax.random.split(key, 8)
    h = jax.random.normal(ks[0], (B, T, D), dtype=jnp.float32)
    emb = jax.random.normal(ks[1], (B, 1, E), dtype=jnp.float32)
    # NOTE: the PyTorch module zero-inits the output Linear (zero_module());
    # nonzero deterministic weights are used so the hot path is exercised.
    w_emb = jax.random.normal(ks[2], (E, 2 * D), dtype=jnp.float32) * 0.05
    b_emb = jax.random.normal(ks[3], (2 * D,), dtype=jnp.float32) * 0.05
    gamma = 1.0 + 0.1 * jax.random.normal(ks[4], (D,), dtype=jnp.float32)
    beta = 0.1 * jax.random.normal(ks[5], (D,), dtype=jnp.float32)
    w_out = jax.random.normal(ks[6], (D, D), dtype=jnp.float32) * 0.05
    b_out = jax.random.normal(ks[7], (D,), dtype=jnp.float32) * 0.05
    return h, emb, w_emb, b_emb, gamma, beta, w_out, b_out


if __name__ == "__main__":
    # Module-consistent small shapes: batch=2, seq=8, latent_dim=32, time_embed_dim=32.
    args = _make_inputs(jax.random.PRNGKey(0), B=2, T=8, D=32, E=32)
    ref = _reference(*args)

    # Explicit f32 matmul (precision mode).
    out_f32 = jax.block_until_ready(
        stylization_block(*args, matmul_dtype=jnp.float32))
    if not jnp.allclose(out_f32, ref, atol=1e-3, rtol=1e-3):
        raise AssertionError("f32 Pallas kernel mismatch vs reference")

    # Default path: bf16 matmul operands, f32 accumulation.
    out_bf16 = jax.block_until_ready(stylization_block(*args))
    if not jnp.allclose(out_bf16, ref, atol=5e-2, rtol=5e-2):
        raise AssertionError("bf16-matmul Pallas kernel mismatch vs reference")

    # Exercise the partial-last-T-tile path (T not divisible by the tile).
    args2 = _make_inputs(jax.random.PRNGKey(1), B=2, T=520, D=32, E=32)
    ref2 = _reference(*args2)
    out2 = jax.block_until_ready(
        stylization_block(*args2, matmul_dtype=jnp.float32))
    if not jnp.allclose(out2, ref2, atol=1e-3, rtol=1e-3):
        raise AssertionError("tiled-T (partial tile) Pallas kernel mismatch vs reference")

    print("KERNEL_OK")
</pallas_src>

<mosaic_0001>
module attributes {stable_mosaic.version = 11 : i64} {
  func.func @_stylize_kernel(%arg0: i32, %arg1: i32, %arg2: memref<1x8x32xf32, #tpu.memory_space<vmem>>, %arg3: memref<1x1x32xf32, #tpu.memory_space<vmem>>, %arg4: memref<1x1x32xf32, #tpu.memory_space<vmem>>, %arg5: memref<1x32xf32, #tpu.memory_space<vmem>>, %arg6: memref<1x32xf32, #tpu.memory_space<vmem>>, %arg7: memref<32x32xf32, #tpu.memory_space<vmem>>, %arg8: memref<1x32xf32, #tpu.memory_space<vmem>>, %arg9: memref<1x8x32xf32, #tpu.memory_space<vmem>>) attributes {dimension_semantics = [#tpu.dimension_semantics<parallel>, #tpu.dimension_semantics<parallel>], iteration_bounds = array<i64: 2, 1>, scalar_prefetch = 0 : i64, scratch_operands = 0 : i64, tpu.core_type = #tpu.core_type<tc>, window_params = [{transform_indices = @transform_0, window_bounds = array<i64: 1, 8, 32>}, {transform_indices = @transform_1, window_bounds = array<i64: 1, 1, 32>}, {transform_indices = @transform_2, window_bounds = array<i64: 1, 1, 32>}, {pipeline_mode = #tpu.pipeline_mode<synchronous>, transform_indices = @transform_3, window_bounds = array<i64: 1, 32>}, {pipeline_mode = #tpu.pipeline_mode<synchronous>, transform_indices = @transform_4, window_bounds = array<i64: 1, 32>}, {pipeline_mode = #tpu.pipeline_mode<synchronous>, transform_indices = @transform_5, window_bounds = array<i64: 32, 32>}, {pipeline_mode = #tpu.pipeline_mode<synchronous>, transform_indices = @transform_6, window_bounds = array<i64: 1, 32>}, {transform_indices = @transform_7, window_bounds = array<i64: 1, 8, 32>}]} {
    %c0 = arith.constant 0 : index
    %c0_0 = arith.constant 0 : index
    %c0_1 = arith.constant 0 : index
    %0 = vector.load %arg2[%c0, %c0_0, %c0_1] : memref<1x8x32xf32, #tpu.memory_space<vmem>>, vector<1x8x32xf32>
    %1 = vector.shape_cast %0 : vector<1x8x32xf32> to vector<8x32xf32>
    %cst = arith.constant dense<0.000000e+00> : vector<8xf32>
    %2 = vector.multi_reduction <add>, %1, %cst [1] : vector<8x32xf32> to vector<8xf32>
    %3 = vector.shape_cast %2 : vector<8xf32> to vector<8x1xf32>
    %cst_2 = arith.constant 3.200000e+01 : f32
    %4 = vector.broadcast %cst_2 : f32 to vector<8x1xf32>
    %5 = arith.divf %3, %4 : vector<8x1xf32>
    %6 = vector.broadcast %5 : vector<8x1xf32> to vector<8x32xf32>
    %7 = arith.subf %1, %6 : vector<8x32xf32>
    %8 = arith.mulf %7, %7 : vector<8x32xf32>
    %cst_3 = arith.constant dense<0.000000e+00> : vector<8xf32>
    %9 = vector.multi_reduction <add>, %8, %cst_3 [1] : vector<8x32xf32> to vector<8xf32>
    %10 = vector.shape_cast %9 : vector<8xf32> to vector<8x1xf32>
    %cst_4 = arith.constant 3.200000e+01 : f32
    %11 = vector.broadcast %cst_4 : f32 to vector<8x1xf32>
    %12 = arith.divf %10, %11 : vector<8x1xf32>
    %cst_5 = arith.constant 9.99999974E-6 : f32
    %13 = vector.broadcast %cst_5 : f32 to vector<8x1xf32>
    %14 = arith.addf %12, %13 : vector<8x1xf32>
    %15 = math.rsqrt %14 : vector<8x1xf32>
    %16 = vector.broadcast %15 : vector<8x1xf32> to vector<8x32xf32>
    %17 = arith.mulf %7, %16 : vector<8x32xf32>
    %c0_6 = arith.constant 0 : index
    %c0_7 = arith.constant 0 : index
    %18 = vector.load %arg5[%c0_6, %c0_7] : memref<1x32xf32, #tpu.memory_space<vmem>>, vector<1x32xf32>
    %19 = vector.broadcast %18 : vector<1x32xf32> to vector<8x32xf32>
    %20 = arith.mulf %17, %19 : vector<8x32xf32>
    %c0_8 = arith.constant 0 : index
    %c0_9 = arith.constant 0 : index
    %21 = vector.load %arg6[%c0_8, %c0_9] : memref<1x32xf32, #tpu.memory_space<vmem>>, vector<1x32xf32>
    %22 = vector.broadcast %21 : vector<1x32xf32> to vector<8x32xf32>
    %23 = arith.addf %20, %22 : vector<8x32xf32>
    %c0_10 = arith.constant 0 : index
    %c0_11 = arith.constant 0 : index
    %c0_12 = arith.constant 0 : index
    %24 = vector.load %arg3[%c0_10, %c0_11, %c0_12] : memref<1x1x32xf32, #tpu.memory_space<vmem>>, vector<1x1x32xf32>
    %25 = vector.shape_cast %24 : vector<1x1x32xf32> to vector<1x32xf32>
    %cst_13 = arith.constant 1.000000e+00 : f32
    %26 = vector.broadcast %cst_13 : f32 to vector<1x32xf32>
    %27 = arith.addf %26, %25 : vector<1x32xf32>
    %28 = vector.broadcast %27 : vector<1x32xf32> to vector<8x32xf32>
    %29 = arith.mulf %23, %28 : vector<8x32xf32>
    %c0_14 = arith.constant 0 : index
    %c0_15 = arith.constant 0 : index
    %c0_16 = arith.constant 0 : index
    %30 = vector.load %arg4[%c0_14, %c0_15, %c0_16] : memref<1x1x32xf32, #tpu.memory_space<vmem>>, vector<1x1x32xf32>
    %31 = vector.shape_cast %30 : vector<1x1x32xf32> to vector<1x32xf32>
    %32 = vector.broadcast %31 : vector<1x32xf32> to vector<8x32xf32>
    %33 = arith.addf %29, %32 : vector<8x32xf32>
    %34 = arith.negf %33 : vector<8x32xf32>
    %35 = math.exp %34 : vector<8x32xf32>
    %cst_17 = arith.constant 1.000000e+00 : f32
    %36 = vector.broadcast %cst_17 : f32 to vector<8x32xf32>
    %37 = arith.addf %36, %35 : vector<8x32xf32>
    %38 = arith.divf %36, %37 : vector<8x32xf32>
    %39 = arith.mulf %33, %38 : vector<8x32xf32>
    %c0_18 = arith.constant 0 : index
    %c0_19 = arith.constant 0 : index
    %40 = vector.load %arg7[%c0_18, %c0_19] : memref<32x32xf32, #tpu.memory_space<vmem>>, vector<32x32xf32>
    %cst_20 = arith.constant dense<0.000000e+00> : vector<8x32xf32>
    %41 = tpu.matmul %39, %40, %cst_20 {dimension_numbers = #tpu.dot_dimension_numbers<[1], [0], [0], [1], [0, 0, 1, 1], [], []>} : vector<8x32xf32>, vector<32x32xf32>, vector<8x32xf32> -> vector<8x32xf32>
    %c0_21 = arith.constant 0 : index
    %c0_22 = arith.constant 0 : index
    %42 = vector.load %arg8[%c0_21, %c0_22] : memref<1x32xf32, #tpu.memory_space<vmem>>, vector<1x32xf32>
    %43 = vector.broadcast %42 : vector<1x32xf32> to vector<8x32xf32>
    %44 = arith.addf %41, %43 : vector<8x32xf32>
    %c0_23 = arith.constant 0 : index
    %c0_24 = arith.constant 0 : index
    %c0_25 = arith.constant 0 : index
    %45 = vector.load %arg9[%c0_23, %c0_24, %c0_25] : memref<1x8x32xf32, #tpu.memory_space<vmem>>, vector<1x8x32xf32>
    %46 = vector.shape_cast %45 : vector<1x8x32xf32> to vector<8x32xf32>
    %47 = vector.shape_cast %44 : vector<8x32xf32> to vector<1x8x32xf32>
    tpu.vector_store %arg9[%c0_23, %c0_24, %c0_25], %47 {strides = array<i32>} : memref<1x8x32xf32, #tpu.memory_space<vmem>>, vector<1x8x32xf32>,
    return
  }
  func.func @transform_0(%arg0: i32, %arg1: i32) -> (i32, i32, i32) {
    %c0_i32 = arith.constant 0 : i32
    %c0_i32_0 = arith.constant 0 : i32
    return %arg0, %arg1, %c0_i32 : i32, i32, i32
  }
  func.func @transform_1(%arg0: i32, %arg1: i32) -> (i32, i32, i32) {
    %c0_i32 = arith.constant 0 : i32
    %c0_i32_0 = arith.constant 0 : i32
    %c0_i32_1 = arith.constant 0 : i32
    return %arg0, %c0_i32, %c0_i32_0 : i32, i32, i32
  }
  func.func @transform_2(%arg0: i32, %arg1: i32) -> (i32, i32, i32) {
    %c0_i32 = arith.constant 0 : i32
    %c0_i32_0 = arith.constant 0 : i32
    %c0_i32_1 = arith.constant 0 : i32
    return %arg0, %c0_i32, %c0_i32_0 : i32, i32, i32
  }
  func.func @transform_3(%arg0: i32, %arg1: i32) -> (i32, i32) {
    %c0_i32 = arith.constant 0 : i32
    %c0_i32_0 = arith.constant 0 : i32
    %c0_i32_1 = arith.constant 0 : i32
    return %c0_i32, %c0_i32_0 : i32, i32
  }
  func.func @transform_4(%arg0: i32, %arg1: i32) -> (i32, i32) {
    %c0_i32 = arith.constant 0 : i32
    %c0_i32_0 = arith.constant 0 : i32
    %c0_i32_1 = arith.constant 0 : i32
    return %c0_i32, %c0_i32_0 : i32, i32
  }
  func.func @transform_5(%arg0: i32, %arg1: i32) -> (i32, i32) {
    %c0_i32 = arith.constant 0 : i32
    %c0_i32_0 = arith.constant 0 : i32
    %c0_i32_1 = arith.constant 0 : i32
    return %c0_i32, %c0_i32_0 : i32, i32
  }
  func.func @transform_6(%arg0: i32, %arg1: i32) -> (i32, i32) {
    %c0_i32 = arith.constant 0 : i32
    %c0_i32_0 = arith.constant 0 : i32
    %c0_i32_1 = arith.constant 0 : i32
    return %c0_i32, %c0_i32_0 : i32, i32
  }
  func.func @transform_7(%arg0: i32, %arg1: i32) -> (i32, i32, i32) {
    %c0_i32 = arith.constant 0 : i32
    %c0_i32_0 = arith.constant 0 : i32
    return %arg0, %arg1, %c0_i32 : i32, i32, i32
  }
}

</mosaic_0001>

<bundles_post_ra>
// kernel: stylization_block.1
= control target key start
LH: loop header
LB: loop body
LE: loop exit
PB: predicated region body
PF: predicated region fallthrough
CT: control target
= control target key end

     0   :  { %12 = vsyncpa [#allocation3], 0  ;;  %s947_s0 = inlined_call_operand.vmem [shape: f32[2,8,32], index: 0, kind: input, shape index: {}]   ;;  %s948_s1 = inlined_call_operand.vmem [shape: f32[2,1,32], index: 1, kind: input, shape index: {}]   ;;  %s949_s2 = inlined_call_operand.vmem [shape: f32[2,1,32], index: 2, kind: input, shape index: {}]   ;;  %s950_s3 = inlined_call_operand.vmem [shape: f32[1,32], index: 3, kind: input, shape index: {}]   ;;  %s951_s4 = inlined_call_operand.vmem [shape: f32[1,32], index: 4, kind: input, shape index: {}]   ;;  %s952_s5 = inlined_call_operand.vmem [shape: f32[32,32], index: 5, kind: input, shape index: {}]   ;;  %s953_s6 = inlined_call_operand.vmem [shape: f32[1,32], index: 6, kind: input, shape index: {}]   ;;  %s954_s7 = inlined_call_operand.hbm [shape: f32[2,8,32], index: 7, kind: output, shape index: {}]  }
   0x1   :  { %14 = vsyncpa [#allocation3 + $0x1], 0  ;;  %s799_s24 = smov 0   ;;  %s801_s25 = smov 0  }
   0x2   :  { %s803_s26 = smov 0   ;;  %s805_s27 = smov 0  }
   0x3   :  { %s807_s28 = smov 0   ;;  %s809_s29 = smov 0  }
   0x4 LB: > { %s572_s30 = sadd.s32 4294967295, %s753_s29   ;;  %s573_s8 = sadd.s32 4294967294, %s753_s29   ;;  %s753_s29 = sphi %s809_s29, %s20_s29   ;;  %s749_s28 = sphi %s807_s28, %s961_s28   ;;  %s745_s27 = sphi %s805_s27, %s960_s27   ;;  %s741_s26 = sphi %s803_s26, %s959_s26   ;;  %s737_s25 = sphi %s801_s25, %s958_s25   ;;  %s733_s24 = sphi %s799_s24, %s957_s24  }
   0x5   : > { %s32_s9 = sadd.s32 1, %s749_s28  ;;  %s205_s10 = sadd.s32 1, %s741_s26 }
   0x6   : > { %p34_p0 = scmp.ge.s32.totalorder %s32_s9, 2  ;;  %p215_p1 = scmp.ne.s32.totalorder %s741_s26, %s737_s25 }
   0x7   : > { %p216_p2 = scmp.eq.s32.totalorder %s572_s30, 1  ;;  %p221_p3 = scmp.ne.s32.totalorder %s737_s25, %s733_s24 }
   0x8   : > { %s963_s9 = smov (%p34_p0, %s32_s9), 0  ;;  %p222_p5 = scmp.eq.s32.totalorder %s573_s8, 1 }
   0x9   : > { %p839_p4 = por %p216_p2, %p215_p1  ;;  %s200_s12 = ssub.s32 %s749_s28, %s963_s9 }
   0xa   : > { %p576_p6 = scmp.ge.s32.totalorder %s753_s29, 1  ;;  %p203_p7 = scmp.eq.s32.totalorder %s200_s12, 0 }
   0xb   : > { %p846_p8 = por %p222_p5, %p221_p3  ;;  %p274_p9 = scmp.lt.s32.totalorder %s753_s29, 3 }
   0xc   : > { %s852_s14 = scalar_select %p203_p7, %s741_s26, %s205_s10  }
   0xd   : > { %p275_p10 = pnand %p576_p6, %p274_p9 }
   0xe   : > { %p314_p11 = scmp.lt.s32.totalorder (!%p275_p10), %s745_s27, 1  ;;  %vm328_vm0 = vcmask (!%p275_p10), 261120   ;;  %v383_v7 = vld [vmem:[%s952_s5] sm:$0xff] (!%p275_p10)  ;;  %v384_v8 = vld [vmem:[%s952_s5 + $0x8] sm:$0xff] (!%p275_p10)  ;;  %v385_v9 = vld [vmem:[%s952_s5 + $0x10] sm:$0xff] (!%p275_p10)  ;;  %v755_v10 = vmov (!%p275_p10), 0.0|0.0   ;;  %v362_v18 = vlaneseq (!%p275_p10) }
   0xf   : > { %278 = sbr.rel (%p275_p10) target bundleno = 600 (0x258), region = 48  ;;  %605 = vmatprep.subr.bf16.mxu0 (!%p275_p10), %v755_v10  ;;  %v606_v11 = vpack.c.bf16 (!%p275_p10), %v384_v8, %v383_v7  ;;  %v386_v12 = vld [vmem:[%s952_s5 + $0x18] sm:$0xff] (!%p275_p10)  ;;  %vm756_vm1 = vmmov (!%p275_p10), 0   ;;  %v757_v13 = vmov (!%p275_p10), 0.0   ;;  %v579_v24 = vld [vmem:[%s950_s3] ss:$0 sm:$0xff] (!%p275_p10) }
  0x10   : > { %602 = vmatprep.mubr.msk.f32.mxu0 (!%p275_p10), %vm756_vm1, %v757_v13  ;;  %v609_v14 = vpack.c.bf16 (!%p275_p10), %v386_v12, %v385_v9  ;;  %v363_v19 = vshrl.u32 (!%p275_p10), %v362_v18, 7  ;;  %v580_v26 = vld [vmem:[%s951_s4] ss:$0 sm:$0xff] (!%p275_p10)  ;;  %s311_s10 = sand.u32 (!%p275_p10), 1, %s737_s25   ;;  %s586_s17 = sshll.u32 (!%p275_p10), %s745_s27, 7 }
  0x11   : > { %607 = vmatpush3.bf16.msra.mxu0 (!%p275_p10), %v606_v11  ;;  %s577_s12 = sshll.u32 (!%p275_p10), %s311_s10, 3  ;;  %v583_v38 = vld [vmem:[%s953_s6] ss:$0 sm:$0xff] (!%p275_p10)  ;;  %s899_s22 = scalar_lea.hbm (!%p275_p10), %s954_s7, %s586_s17 }
  0x12   : > { %608 = vmatprep.subr.bf16.mxu0 (!%p275_p10), %v755_v10  ;;  %v364_v22 = vsub.s32 (!%p275_p10), 0, %v363_v19  ;;  %s469_s23 = scalar_lea.sflag (!%p275_p10), [#allocation3], %s311_s10 }
  0x15   : > { %610 = vmatpush3.bf16.msra.mxu0 (!%p275_p10), %v609_v14 }
  0x16   : > { %s856_s15 = scalar_select %p314_p11, %s745_s27, 1 }
  0x17   : > { %s758_s27 = smov [#allocation2]  }
  0x18   : > { %s578_s16 = sshll.u32 %s856_s15, 3  ;;  %s323_s18 = scalar_lea.vmem %s948_s1, %s856_s15 }
  0x19   : > { %s320_s19 = scalar_lea.vmem %s947_s0, %s578_s16  ;;  %v359_v20 = vld [vmem:[%s323_s18] sm:$0x1]  ;;  %s326_s8 = scalar_lea.vmem %s949_s2, %s856_s15 }
  0x1a   : > { %v327_v0 = vld [vmem:[%s320_s19] sm:$0xff]  ;;  %v360_v21 = vadd.f32 1.0, %v359_v20  ;;  %s313_s18 = scalar_lea.vmem [#allocation2], %s577_s12 }
  0x1b   : > { %v329_v1 = vsel %vm328_vm0, %v327_v0, 0.0  ;;  %v581_v30 = vld [vmem:[%s326_s8] ss:$0 sm:$0xff]  ;;  %s483_s19 = sshll.u32 %s313_s18, 4  ;;  %s679_s8 = sshll.u32 %s758_s27, 4  ;;  %s901_s19 = int_to_ptr.vmem [resolvable:$true] %s483_s19  ;;  %s680_s8 = int_to_ptr.vmem [resolvable:$false] %s679_s8 }
  0x1c   : > { %330 = vadd.xlane.f32.xlu0 %v329_v1  ;;  %v365_v27 = vrot.slane %v360_v21, %v364_v22  ;;  %s675_s30 = scalar_lea.vmem %s901_s19, 128  ;;  %s681_s12 = scalar_lea.vmem %s680_s8, 256 }
  0x1d   : > { %p676_p12 = scmp.ne.s32.totalorder %s901_s19, %s675_s30  ;;  %p682_p1 = scmp.lt.s32.totalorder %s901_s19, %s680_s8 }
  0x1e   : > { %p683_p2 = scmp.lt.s32.totalorder %s681_s12, %s675_s30 }
  0x1f   : > { %p677_p13 = pnand %p676_p12, %p839_p4 }
  0x20   : > { %p684_p3 = por %p683_p2, %p682_p1 }
  0x21   : > { %p678_p0 = pneg %p677_p13 }
  0x23   : > { %p685_p5 = pnand %p684_p3, %p678_p0 }
  0xa9   : > { %v331_v2 = vpop.xlane.xlu0 %330 }
  0xaa   : > { %v333_v3 = vmul.f32 0.03125, %v331_v2 }
  0xac   : > { %v334_v4 = vsub.f32 %v327_v0, %v333_v3 }
  0xae   : > { %v335_v5 = vmul.f32 %v334_v4, %v334_v4 }
  0xb0   : > { %v336_v6 = vsel %vm328_vm0, %v335_v5, 0.0 }
  0xb1   : > { %337 = vadd.xlane.f32.xlu0 %v336_v6 }
 0x13e   : > { %v338_v15 = vpop.xlane.xlu0 %337 }
 0x13f   : > { %v339_v16 = vmul.f32 0.03125, %v338_v15 }
 0x141   : > { %v340_v17 = vadd.f32 1e-05, %v339_v16 }
 0x143   : > { %669 = vrsqrt.f32 %v340_v17 }
 0x14d   : > { %v670_v23 = vpop.eup %669 }
 0x14e   : > { %v342_v25 = vmul.f32 %v670_v23, %v334_v4 }
 0x150   : > { %v350_v28 = vmul.f32 %v579_v24, %v342_v25 }
 0x152   : > { %v358_v29 = vadd.f32 %v580_v26, %v350_v28 }
 0x154   : > { %v367_v31 = vmul.f32 %v365_v27, %v358_v29 }
 0x156   : > { %v375_v32 = vadd.f32 %v581_v30, %v367_v31 }
 0x158   : > { %v582_v33 = vmul.f32 -1.442695, %v375_v32 }
 0x15a   : > { %671 = vpow2.f32 %v582_v33 }
 0x164   : > { %v672_v34 = vpop.eup %671 }
 0x165   : > { %v379_v35 = vadd.f32 1.0, %v672_v34 }
 0x167   : > { %673 = vrcp.f32 %v379_v35 }
 0x171   : > { %v674_v36 = vpop.eup %673 }
 0x172   : > { %v382_v37 = vmul.f32 %v674_v36, %v375_v32 }
 0x174   : > { %603 = vmatmul.mubr.msk.f32.vlgmr.msra.gmra.mrb[0].mxu0 %vm328_vm0, %v382_v37 }
 0x247   : > { %v463_v39 = vpop.f32.mrb[0].mxu0 }
 0x248   : > { %v464_v40 = vadd.f32 %v583_v38, %v463_v39  ;;  %v604_v41 = vpop.f32.mrb[1].mxu0 }
 0x24a   : > { %467 = vst.msk [vmem:[%s313_s18] sm:$0xff] %vm328_vm0, %v464_v40 }
 0x24b   : > { %688 = shalt.err (!%p685_p5)
}
 0x24c   : > { %s689_s10 = scalar_lea.hbm %s899_s22, 128  ;;  %s693_s17 = scalar_lea.hbm %s954_s7, 256 }
 0x24d   : > { %p690_p6 = scmp.ne.s32.totalorder %s899_s22, %s689_s10  ;;  %p694_p10 = scmp.lt.u32.totalorder %s899_s22, %s954_s7 }
 0x24e   : > { %p695_p11 = scmp.lt.u32.totalorder %s693_s17, %s689_s10  ;;  %p697_p13 = scmp.lt.u32.totalorder %s689_s10, %s899_s22 }
 0x24f   : > { %p691_p7 = pnand %p690_p6, %p839_p4 }
 0x250   : > { %p696_p12 = por %p695_p11, %p694_p10 }
 0x251   : > { %p692_p9 = pneg %p691_p7 }
 0x252   : > { %p698_p0 = por %p697_p13, %p696_p12 }
 0x254   : > { %p699_p1 = pnand %p698_p0, %p692_p9 }
 0x256   : > { %702 = shalt.err (!%p699_p1)
}
 0x257   : > { %611 = dma.vmem_to_hbm [thread:$0]  (%p839_p4), %s901_s19, 128, %s899_s22, %s469_s23  }
 0x258 PF: > { %p617_p2 = scmp.ge.s32.totalorder %s753_s29, 2  ;;  %s495_s21 = sand.u32 1, %s733_s24  }
 0x259   : > { %s496_s30 = scalar_lea.sflag [#allocation3], %s495_s21 }
 0x25a   : > { %p614_p3 = pnand %p617_p2, %p846_p8 }
 0x25c   : > { %728 = dma.done.wait (!%p614_p3), %s496_s30, 128  }
 0x25d   : > { %730 = vsyncadd (!%p614_p3), %s496_s30, 4294967168  ;;  %s20_s29 = sadd.s32 1, %s753_s29   ;;  %s957_s24 = smov %s737_s25 }
 0x25e   : > { %p17_p5 = scmp.ge.s32.totalorder %s20_s29, 4   ;;  %s958_s25 = smov %s741_s26 }
 0x25f   : > { %s959_s26 = smov %s852_s14  ;;  %s960_s27 = smov %s749_s28 }
 0x260   : > { %s961_s28 = smov %s963_s9  ;;  %19 = sbr.rel (!%p17_p5) target bundleno = 4 (0x4), region = 89 }
 0x267   :  { %501 = vsyncpa [#allocation3], 1 }
 0x268   :  { %503 = vsyncpa [#allocation3 + $0x1], 1 }

</bundles_post_ra>
